<compile_context>
chip_gen: v5e
topology: v5e:2x2
jax: 0.10.0
libtpu: 0.0.40
codegen_flags: <defaults>
</compile_context>

<pallas_src>
import functools

import jax
import jax.numpy as jnp
from jax.experimental import pallas as pl
from jax.experimental.pallas import tpu as pltpu


def _round_up(x, m):
    return ((x + m - 1) // m) * m


def _mv_proj_kernel(x_ref, w1_ref, b1_ref, w2_ref, b2_ref, o_ref):
    # x_ref:  (TB, D)        w1_ref: (D, V*P)   b1_ref: (1, V*P)  [f32]
    # w2_ref: (V, P, P)      b2_ref: (1, V*P)   [f32]
    # o_ref:  (TB, V*P)
    V, P, _ = w2_ref.shape
    cdt = w1_ref.dtype  # compute dtype for MXU operands (bf16 or f32)

    # Cast the streamed activations in-kernel (no wrapper-side copy), then one
    # fused (TB,D)x(D,V*P) MXU matmul feeding all views, f32 accumulation.
    x = x_ref[...].astype(cdt)
    h = jnp.dot(x, w1_ref[...], preferred_element_type=jnp.float32)
    # Bias + ReLU on the f32 accumulator (VPU).
    h = jnp.maximum(h + b1_ref[...], 0.0)

    # Second layer: per-view (TB,P)x(P,P), statically unrolled (V is tiny).
    # Each slice is 128-lane aligned -> full-width unmasked stores, no concat
    # temp, lower vreg pressure.
    for v in range(V):
        hv = h[:, v * P:(v + 1) * P].astype(cdt)
        yv = jnp.dot(hv, w2_ref[v], preferred_element_type=jnp.float32)
        yv = yv + b2_ref[:, v * P:(v + 1) * P]
        o_ref[:, v * P:(v + 1) * P] = yv.astype(o_ref.dtype)


def prepare_params(w1, b1, w2, b2, *, compute_dtype=jnp.bfloat16):
    """One-time weight prep (do this at init / checkpoint load, NOT per call).

    w1: (V, D, P), b1: (V, 1, P), w2: (V, P, P), b2: (V, 1, P)
    Returns (w1_fused(D,V*P), b1(1,V*P) f32, w2(V,P,P), b2(1,V*P) f32) with the
    matmul operands cast to compute_dtype."""
    V, D, P = w1.shape
    # Column v*P+p of the fused matrix is view v, hidden unit p (consistent
    # with the bias / output layout below).
    w1_fused = jnp.transpose(w1, (1, 0, 2)).reshape(D, V * P).astype(compute_dtype)
    b1_fused = b1.reshape(1, V * P).astype(jnp.float32)
    w2_c = w2.astype(compute_dtype)
    b2_fused = b2.reshape(1, V * P).astype(jnp.float32)
    return w1_fused, b1_fused, w2_c, b2_fused


@functools.partial(jax.jit, static_argnames=("max_tile_b",))
def multi_view_projection_head(x_flat, prepared_params, *, max_tile_b=512):
    """x_flat: (B, D) in f32/bf16; prepared_params from prepare_params().

    Returns (B, V, P), matching torch.cat([head(x).unsqueeze(1) ...], dim=1)."""
    w1_fused, b1_fused, w2_c, b2_fused = prepared_params
    B, D = x_flat.shape
    V, P, _ = w2_c.shape
    VP = V * P

    # Batch tiling: pad B to a sublane multiple (and to the tile), stream
    # x/out per tile, keep weights VMEM-resident (constant index maps).
    TB = min(max_tile_b, _round_up(B, 8))
    B_pad = _round_up(B, TB)
    if B_pad != B:
        x_flat = jnp.pad(x_flat, ((0, B_pad - B), (0, 0)))
    grid = (B_pad // TB,)

    itemsize_w = jnp.dtype(w1_fused.dtype).itemsize
    cost = pl.CostEstimate(
        flops=2 * B_pad * (D * VP + V * P * P),
        transcendentals=0,
        bytes_accessed=(B_pad * D * jnp.dtype(x_flat.dtype).itemsize
                        + (D * VP + V * P * P) * itemsize_w
                        + 2 * VP * 4
                        + B_pad * VP * jnp.dtype(x_flat.dtype).itemsize),
    )

    out_flat = pl.pallas_call(
        _mv_proj_kernel,
        out_shape=jax.ShapeDtypeStruct((B_pad, VP), x_flat.dtype),
        grid_spec=pltpu.PrefetchScalarGridSpec(
            num_scalar_prefetch=0,
            grid=grid,
            in_specs=[
                pl.BlockSpec((TB, D), lambda i: (i, 0)),        # x (streamed)
                pl.BlockSpec((D, VP), lambda i: (0, 0)),        # fused W1 (resident)
                pl.BlockSpec((1, VP), lambda i: (0, 0)),        # fused b1 (f32)
                pl.BlockSpec((V, P, P), lambda i: (0, 0, 0)),   # W2 (resident)
                pl.BlockSpec((1, VP), lambda i: (0, 0)),        # fused b2 (f32)
            ],
            out_specs=pl.BlockSpec((TB, VP), lambda i: (i, 0)), # out (streamed)
        ),
        compiler_params=pltpu.CompilerParams(
            dimension_semantics=("parallel",)),                 # shards TCs on v7x
        cost_estimate=cost,
    )(x_flat, w1_fused, b1_fused, w2_c, b2_fused)

    # (B, V*P) is view-major along lanes -> reshape is a metadata op.
    return out_flat[:B].reshape(B, V, P)


def init_params(key, input_dim, proj_dim, num_views, pad_size=64):
    D = pad_size * input_dim
    ks = jax.random.split(key, 4 * num_views)
    w1, b1, w2, b2 = [], [], [], []
    for v in range(num_views):
        k1, k2, k3, k4 = ks[4 * v: 4 * v + 4]
        lim1 = 1.0 / jnp.sqrt(D)
        lim2 = 1.0 / jnp.sqrt(proj_dim)
        w1.append(jax.random.uniform(k1, (D, proj_dim), jnp.float32, -lim1, lim1))
        b1.append(jax.random.uniform(k2, (1, proj_dim), jnp.float32, -lim1, lim1))
        w2.append(jax.random.uniform(k3, (proj_dim, proj_dim), jnp.float32, -lim2, lim2))
        b2.append(jax.random.uniform(k4, (1, proj_dim), jnp.float32, -lim2, lim2))
    return (jnp.stack(w1), jnp.stack(b1), jnp.stack(w2), jnp.stack(b2))


if __name__ == "__main__":
    # Shapes consistent with the module: pad_size=64, input_dim=4,
    # proj_dim=128, num_views=3, batch=2.  (For real workloads feed B >= 256
    # per call; B=2 is padded to 8 rows internally.)
    input_dim, proj_dim, num_views, pad_size = 4, 128, 3, 64
    B = 2

    key = jax.random.PRNGKey(0)
    kx, kp = jax.random.split(key)
    x = jax.random.normal(kx, (B, pad_size, input_dim), jnp.float32)   # (B, 64, 4)
    w1, b1, w2, b2 = init_params(kp, input_dim, proj_dim, num_views, pad_size)

    # Glue: torch.flatten(x, start_dim=1)
    x_flat = x.reshape(B, -1)                                           # (B, 256)

    # --- f32 path: exact match against the PyTorch-equivalent reference ----
    params_f32 = prepare_params(w1, b1, w2, b2, compute_dtype=jnp.float32)
    out_f32 = jax.block_until_ready(
        multi_view_projection_head(x_flat, params_f32))
    ref_f32 = jnp.stack(
        [jnp.maximum(x_flat @ w1[v] + b1[v], 0.0) @ w2[v] + b2[v]
         for v in range(num_views)], axis=1)
    assert out_f32.shape == (B, num_views, proj_dim)
    assert jnp.allclose(out_f32, ref_f32, atol=1e-4, rtol=1e-4)

    # --- default bf16 MXU path (f32 accumulation): halved weight DMA --------
    params_bf16 = prepare_params(w1, b1, w2, b2)                        # bf16 default
    out_bf16 = jax.block_until_ready(
        multi_view_projection_head(x_flat, params_bf16))
    xb = x_flat.astype(jnp.bfloat16)
    ref_bf16 = []
    for v in range(num_views):
        hv = jnp.maximum(
            jnp.dot(xb, w1[v].astype(jnp.bfloat16),
                    preferred_element_type=jnp.float32) + b1[v], 0.0)
        ref_bf16.append(
            jnp.dot(hv.astype(jnp.bfloat16), w2[v].astype(jnp.bfloat16),
                    preferred_element_type=jnp.float32) + b2[v])
    ref_bf16 = jnp.stack(ref_bf16, axis=1)
    assert out_bf16.shape == (B, num_views, proj_dim)
    assert jnp.allclose(out_bf16, ref_bf16, atol=2e-2, rtol=2e-2)
    assert jnp.allclose(out_bf16, ref_f32, atol=5e-2, rtol=5e-2)

    print("KERNEL_OK")
</pallas_src>

<mosaic_0001>
module attributes {stable_mosaic.version = 11 : i64} {
  func.func @_mv_proj_kernel(%arg0: i32, %arg1: memref<8x256xf32, #tpu.memory_space<vmem>>, %arg2: memref<256x384xf32, #tpu.memory_space<vmem>>, %arg3: memref<1x384xf32, #tpu.memory_space<vmem>>, %arg4: memref<3x128x128xf32, #tpu.memory_space<vmem>>, %arg5: memref<1x384xf32, #tpu.memory_space<vmem>>, %arg6: memref<8x384xf32, #tpu.memory_space<vmem>>) attributes {dimension_semantics = [#tpu.dimension_semantics<parallel>], iteration_bounds = array<i64: 1>, scalar_prefetch = 0 : i64, scratch_operands = 0 : i64, tpu.core_type = #tpu.core_type<tc>, window_params = [{transform_indices = @transform_0, window_bounds = array<i64: 8, 256>}, {pipeline_mode = #tpu.pipeline_mode<synchronous>, transform_indices = @transform_1, window_bounds = array<i64: 256, 384>}, {pipeline_mode = #tpu.pipeline_mode<synchronous>, transform_indices = @transform_2, window_bounds = array<i64: 1, 384>}, {pipeline_mode = #tpu.pipeline_mode<synchronous>, transform_indices = @transform_3, window_bounds = array<i64: 3, 128, 128>}, {pipeline_mode = #tpu.pipeline_mode<synchronous>, transform_indices = @transform_4, window_bounds = array<i64: 1, 384>}, {transform_indices = @transform_5, window_bounds = array<i64: 8, 384>}]} {
    %c0 = arith.constant 0 : index
    %c0_0 = arith.constant 0 : index
    %0 = vector.load %arg1[%c0, %c0_0] : memref<8x256xf32, #tpu.memory_space<vmem>>, vector<8x256xf32>
    %c0_1 = arith.constant 0 : index
    %c0_2 = arith.constant 0 : index
    %1 = vector.load %arg2[%c0_1, %c0_2] : memref<256x384xf32, #tpu.memory_space<vmem>>, vector<256x384xf32>
    %cst = arith.constant dense<0.000000e+00> : vector<8x384xf32>
    %2 = tpu.matmul %0, %1, %cst {dimension_numbers = #tpu.dot_dimension_numbers<[1], [0], [0], [1], [0, 0, 1, 1], [], []>} : vector<8x256xf32>, vector<256x384xf32>, vector<8x384xf32> -> vector<8x384xf32>
    %c0_3 = arith.constant 0 : index
    %c0_4 = arith.constant 0 : index
    %3 = vector.load %arg3[%c0_3, %c0_4] : memref<1x384xf32, #tpu.memory_space<vmem>>, vector<1x384xf32>
    %4 = vector.broadcast %3 : vector<1x384xf32> to vector<8x384xf32>
    %5 = arith.addf %2, %4 : vector<8x384xf32>
    %cst_5 = arith.constant 0.000000e+00 : f32
    %6 = vector.broadcast %cst_5 : f32 to vector<8x384xf32>
    %7 = arith.maximumf %5, %6 : vector<8x384xf32>
    %8 = vector.extract_strided_slice %7 {offsets = [0, 0], sizes = [8, 128], strides = [1, 1]} : vector<8x384xf32> to vector<8x128xf32>
    %c0_6 = arith.constant 0 : index
    %c0_7 = arith.constant 0 : index
    %c0_8 = arith.constant 0 : index
    %9 = vector.load %arg4[%c0_6, %c0_7, %c0_8] : memref<3x128x128xf32, #tpu.memory_space<vmem>>, vector<1x128x128xf32>
    %10 = vector.shape_cast %9 : vector<1x128x128xf32> to vector<128x128xf32>
    %cst_9 = arith.constant dense<0.000000e+00> : vector<8x128xf32>
    %11 = tpu.matmul %8, %10, %cst_9 {dimension_numbers = #tpu.dot_dimension_numbers<[1], [0], [0], [1], [0, 0, 1, 1], [], []>} : vector<8x128xf32>, vector<128x128xf32>, vector<8x128xf32> -> vector<8x128xf32>
    %c0_10 = arith.constant 0 : index
    %c0_11 = arith.constant 0 : index
    %12 = vector.load %arg5[%c0_10, %c0_11] : memref<1x384xf32, #tpu.memory_space<vmem>>, vector<1x128xf32>
    %13 = vector.broadcast %12 : vector<1x128xf32> to vector<8x128xf32>
    %14 = arith.addf %11, %13 : vector<8x128xf32>
    %c0_12 = arith.constant 0 : index
    %c0_13 = arith.constant 0 : index
    %15 = vector.load %arg6[%c0_12, %c0_13] : memref<8x384xf32, #tpu.memory_space<vmem>>, vector<8x128xf32>
    tpu.vector_store %arg6[%c0_12, %c0_13], %14 {strides = array<i32>} : memref<8x384xf32, #tpu.memory_space<vmem>>, vector<8x128xf32>,
    %16 = vector.extract_strided_slice %7 {offsets = [0, 128], sizes = [8, 128], strides = [1, 1]} : vector<8x384xf32> to vector<8x128xf32>
    %c1 = arith.constant 1 : index
    %c0_14 = arith.constant 0 : index
    %c0_15 = arith.constant 0 : index
    %17 = vector.load %arg4[%c1, %c0_14, %c0_15] : memref<3x128x128xf32, #tpu.memory_space<vmem>>, vector<1x128x128xf32>
    %18 = vector.shape_cast %17 : vector<1x128x128xf32> to vector<128x128xf32>
    %cst_16 = arith.constant dense<0.000000e+00> : vector<8x128xf32>
    %19 = tpu.matmul %16, %18, %cst_16 {dimension_numbers = #tpu.dot_dimension_numbers<[1], [0], [0], [1], [0, 0, 1, 1], [], []>} : vector<8x128xf32>, vector<128x128xf32>, vector<8x128xf32> -> vector<8x128xf32>
    %c0_17 = arith.constant 0 : index
    %c128 = arith.constant 128 : index
    %20 = vector.load %arg5[%c0_17, %c128] : memref<1x384xf32, #tpu.memory_space<vmem>>, vector<1x128xf32>
    %21 = vector.broadcast %20 : vector<1x128xf32> to vector<8x128xf32>
    %22 = arith.addf %19, %21 : vector<8x128xf32>
    %c0_18 = arith.constant 0 : index
    %c128_19 = arith.constant 128 : index
    %23 = vector.load %arg6[%c0_18, %c128_19] : memref<8x384xf32, #tpu.memory_space<vmem>>, vector<8x128xf32>
    tpu.vector_store %arg6[%c0_18, %c128_19], %22 {strides = array<i32>} : memref<8x384xf32, #tpu.memory_space<vmem>>, vector<8x128xf32>,
    %24 = vector.extract_strided_slice %7 {offsets = [0, 256], sizes = [8, 128], strides = [1, 1]} : vector<8x384xf32> to vector<8x128xf32>
    %c2 = arith.constant 2 : index
    %c0_20 = arith.constant 0 : index
    %c0_21 = arith.constant 0 : index
    %25 = vector.load %arg4[%c2, %c0_20, %c0_21] : memref<3x128x128xf32, #tpu.memory_space<vmem>>, vector<1x128x128xf32>
    %26 = vector.shape_cast %25 : vector<1x128x128xf32> to vector<128x128xf32>
    %cst_22 = arith.constant dense<0.000000e+00> : vector<8x128xf32>
    %27 = tpu.matmul %24, %26, %cst_22 {dimension_numbers = #tpu.dot_dimension_numbers<[1], [0], [0], [1], [0, 0, 1, 1], [], []>} : vector<8x128xf32>, vector<128x128xf32>, vector<8x128xf32> -> vector<8x128xf32>
    %c0_23 = arith.constant 0 : index
    %c256 = arith.constant 256 : index
    %28 = vector.load %arg5[%c0_23, %c256] : memref<1x384xf32, #tpu.memory_space<vmem>>, vector<1x128xf32>
    %29 = vector.broadcast %28 : vector<1x128xf32> to vector<8x128xf32>
    %30 = arith.addf %27, %29 : vector<8x128xf32>
    %c0_24 = arith.constant 0 : index
    %c256_25 = arith.constant 256 : index
    %31 = vector.load %arg6[%c0_24, %c256_25] : memref<8x384xf32, #tpu.memory_space<vmem>>, vector<8x128xf32>
    tpu.vector_store %arg6[%c0_24, %c256_25], %30 {strides = array<i32>} : memref<8x384xf32, #tpu.memory_space<vmem>>, vector<8x128xf32>,
    return
  }
  func.func @transform_0(%arg0: i32) -> (i32, i32) {
    %c0_i32 = arith.constant 0 : i32
    %c0_i32_0 = arith.constant 0 : i32
    return %arg0, %c0_i32 : i32, i32
  }
  func.func @transform_1(%arg0: i32) -> (i32, i32) {
    %c0_i32 = arith.constant 0 : i32
    %c0_i32_0 = arith.constant 0 : i32
    %c0_i32_1 = arith.constant 0 : i32
    return %c0_i32, %c0_i32_0 : i32, i32
  }
  func.func @transform_2(%arg0: i32) -> (i32, i32) {
    %c0_i32 = arith.constant 0 : i32
    %c0_i32_0 = arith.constant 0 : i32
    %c0_i32_1 = arith.constant 0 : i32
    return %c0_i32, %c0_i32_0 : i32, i32
  }
  func.func @transform_3(%arg0: i32) -> (i32, i32, i32) {
    %c0_i32 = arith.constant 0 : i32
    %c0_i32_0 = arith.constant 0 : i32
    %c0_i32_1 = arith.constant 0 : i32
    %c0_i32_2 = arith.constant 0 : i32
    return %c0_i32, %c0_i32_0, %c0_i32_1 : i32, i32, i32
  }
  func.func @transform_4(%arg0: i32) -> (i32, i32) {
    %c0_i32 = arith.constant 0 : i32
    %c0_i32_0 = arith.constant 0 : i32
    %c0_i32_1 = arith.constant 0 : i32
    return %c0_i32, %c0_i32_0 : i32, i32
  }
  func.func @transform_5(%arg0: i32) -> (i32, i32) {
    %c0_i32 = arith.constant 0 : i32
    %c0_i32_0 = arith.constant 0 : i32
    return %arg0, %c0_i32 : i32, i32
  }
}

</mosaic_0001>

<bundles_post_ra>
// kernel: multi_view_projection_head.1
= control target key start
LH: loop header
LB: loop body
LE: loop exit
PB: predicated region body
PF: predicated region fallthrough
CT: control target
= control target key end

     0   :  { %10 = vsyncpa [#allocation3], 0  ;;  %s552_s0 = inlined_call_operand.vmem [shape: f32[8,256], index: 0, kind: input, shape index: {}]   ;;  %s553_s1 = inlined_call_operand.hbm [shape: f32[256,384], index: 1, kind: input, shape index: {}]   ;;  %s554_s2 = inlined_call_operand.vmem [shape: f32[1,384], index: 2, kind: input, shape index: {}]   ;;  %s555_s3 = inlined_call_operand.hbm [shape: f32[3,128,128], index: 3, kind: input, shape index: {}]   ;;  %s556_s4 = inlined_call_operand.vmem [shape: f32[1,384], index: 4, kind: input, shape index: {}]   ;;  %s557_s5 = inlined_call_operand.vmem [shape: f32[8,384], index: 5, kind: output, shape index: {}]  }
   0x1   :  { %s18_s20 = sshll.u32 %s553_s1, 4  ;;  %s19_s20 = int_to_ptr.hbm [resolvable:$true] %s18_s20 }
   0x2   :  { %11 = vsyncpa [#allocation5], 0  ;;  %s473_s21 = smov [#allocation2]   ;;  %s33_s25 = sshll.u32 %s555_s3, 4  ;;  %s34_s25 = int_to_ptr.hbm [resolvable:$true] %s33_s25 }
   0x3   :  { %s20_s22 = sshll.u32 %s473_s21, 4  ;;  %s474_s26 = smov 384   ;;  %s21_s22 = int_to_ptr.vmem [resolvable:$true] %s20_s22 }
   0x4   :  { %s475_s27 = smov 24   ;;  %s476_s28 = smov [#allocation4]  }
   0x5   :  { %26 = dma.hbm_to_vmem [thread:$0]  %s19_s20, 12288, %s21_s22, [#allocation3], %s474_s26, %s474_s26, %s475_s27  }
   0x6   :  { %s35_s29 = sshll.u32 %s476_s28, 4  ;;  %s477_s30 = smov 128   ;;  %s36_s29 = int_to_ptr.vmem [resolvable:$true] %s35_s29 }
   0x7   :  { %s478_s6 = smov 8  }
   0x8   :  { %41 = dma.hbm_to_vmem [thread:$0]  %s34_s25, 6144, %s36_s29, [#allocation5], %s477_s30, %s477_s30, %s478_s6  }
   0x9   :  { %469 = dma.done.wait [#allocation3], 12288  }
   0xa   :  { %470 = vsyncadd [#allocation3], 4294955008 }
   0xb   :  { %471 = dma.done.wait [#allocation5], 6144  }
   0xc   :  { %472 = vsyncadd [#allocation5], 4294961152  ;;  %v99_v0 = vld [vmem:[#allocation2 + $0x168] sm:$0xff]  ;;  %v96_v1 = vld [vmem:[#allocation2 + $0x150] sm:$0xff] }
   0xd   :  { %v147_v2 = vld [vmem:[#allocation2 + $0x2e8] sm:$0xff]  ;;  %158 = vmatpush.msra.mxu0 %v99_v0  ;;  %v144_v3 = vld [vmem:[#allocation2 + $0x2d0] sm:$0xff]  ;;  %v93_v4 = vld [vmem:[#allocation2 + $0x138] sm:$0xff] }
   0xe   :  { %178 = vmatpush.msra.mxu1 %v147_v2  ;;  %v141_v5 = vld [vmem:[#allocation2 + $0x2b8] sm:$0xff]  ;;  %v90_v6 = vld [vmem:[#allocation2 + $0x120] sm:$0xff]  ;;  %v87_v8 = vld [vmem:[#allocation2 + $0x108] sm:$0xff] }
   0xf   :  { %159 = vmatpush.msra.mxu0 %v96_v1  ;;  %v138_v7 = vld [vmem:[#allocation2 + $0x2a0] sm:$0xff]  ;;  %v135_v9 = vld [vmem:[#allocation2 + $0x288] sm:$0xff]  ;;  %v100_v10 = vld [vmem:[#allocation2 + $0x170] sm:$0xff] }
  0x10   :  { %179 = vmatpush.msra.mxu1 %v144_v3  ;;  %v97_v11 = vld [vmem:[#allocation2 + $0x158] sm:$0xff]  ;;  %v148_v12 = vld [vmem:[#allocation2 + $0x2f0] sm:$0xff]  ;;  %198 = vmatpush.msra.mxu2 %v100_v10  ;;  %v94_v15 = vld [vmem:[#allocation2 + $0x140] sm:$0xff] }
  0x11   :  { %160 = vmatpush.msra.mxu0 %v93_v4  ;;  %v84_v13 = vld [vmem:[#allocation2 + $0xf0] sm:$0xff]  ;;  %218 = vmatpush.msra.mxu3 %v148_v12  ;;  %v145_v16 = vld [vmem:[#allocation2 + $0x2d8] sm:$0xff]  ;;  %v142_v19 = vld [vmem:[#allocation2 + $0x2c0] sm:$0xff] }
  0x12   :  { %180 = vmatpush.msra.mxu1 %v141_v5  ;;  %v132_v14 = vld [vmem:[#allocation2 + $0x270] sm:$0xff]  ;;  %v81_v17 = vld [vmem:[#allocation2 + $0xd8] sm:$0xff]  ;;  %199 = vmatpush.msra.mxu2 %v97_v11  ;;  %v91_v20 = vld [vmem:[#allocation2 + $0x128] sm:$0xff] }
  0x13   :  { %161 = vmatpush.msra.mxu0 %v90_v6  ;;  %v129_v18 = vld [vmem:[#allocation2 + $0x258] sm:$0xff]  ;;  %219 = vmatpush.msra.mxu3 %v145_v16  ;;  %v139_v21 = vld [vmem:[#allocation2 + $0x2a8] sm:$0xff]  ;;  %v78_v22 = vld [vmem:[#allocation2 + $0xc0] sm:$0xff] }
  0x14   :  { %181 = vmatpush.msra.mxu1 %v138_v7  ;;  %v126_v23 = vld [vmem:[#allocation2 + $0x240] sm:$0xff]  ;;  %200 = vmatpush.msra.mxu2 %v94_v15  ;;  %v88_v24 = vld [vmem:[#allocation2 + $0x110] sm:$0xff]  ;;  %v75_v26 = vld [vmem:[#allocation2 + $0xa8] sm:$0xff] }
  0x15   :  { %162 = vmatpush.msra.mxu0 %v87_v8  ;;  %220 = vmatpush.msra.mxu3 %v142_v19  ;;  %v136_v25 = vld [vmem:[#allocation2 + $0x290] sm:$0xff]  ;;  %v123_v27 = vld [vmem:[#allocation2 + $0x228] sm:$0xff]  ;;  %v85_v28 = vld [vmem:[#allocation2 + $0xf8] sm:$0xff] }
  0x16   :  { %182 = vmatpush.msra.mxu1 %v135_v9  ;;  %201 = vmatpush.msra.mxu2 %v91_v20  ;;  %v133_v29 = vld [vmem:[#allocation2 + $0x278] sm:$0xff]  ;;  %v72_v30 = vld [vmem:[#allocation2 + $0x90] sm:$0xff]  ;;  %v82_v32 = vld [vmem:[#allocation2 + $0xe0] sm:$0xff] }
  0x17   :  { %163 = vmatpush.msra.mxu0 %v84_v13  ;;  %221 = vmatpush.msra.mxu3 %v139_v21  ;;  %v120_v31 = vld [vmem:[#allocation2 + $0x210] sm:$0xff]  ;;  %v130_v33 = vld [vmem:[#allocation2 + $0x260] sm:$0xff]  ;;  %v69_v34 = vld [vmem:[#allocation2 + $0x78] sm:$0xff] }
  0x18   :  { %183 = vmatpush.msra.mxu1 %v132_v14  ;;  %202 = vmatpush.msra.mxu2 %v88_v24  ;;  %v117_v35 = vld [vmem:[#allocation2 + $0x1f8] sm:$0xff]  ;;  %v79_v36 = vld [vmem:[#allocation2 + $0xc8] sm:$0xff]  ;;  %v66_v38 = vld [vmem:[#allocation2 + $0x60] sm:$0xff] }
  0x19   :  { %164 = vmatpush.msra.mxu0 %v81_v17  ;;  %222 = vmatpush.msra.mxu3 %v136_v25  ;;  %v127_v37 = vld [vmem:[#allocation2 + $0x248] sm:$0xff]  ;;  %v114_v39 = vld [vmem:[#allocation2 + $0x1e0] sm:$0xff]  ;;  %v76_v40 = vld [vmem:[#allocation2 + $0xb0] sm:$0xff] }
  0x1a   :  { %184 = vmatpush.msra.mxu1 %v129_v18  ;;  %203 = vmatpush.msra.mxu2 %v85_v28  ;;  %v124_v41 = vld [vmem:[#allocation2 + $0x230] sm:$0xff]  ;;  %v63_v42 = vld [vmem:[#allocation2 + $0x48] sm:$0xff]  ;;  %v73_v44 = vld [vmem:[#allocation2 + $0x98] sm:$0xff] }
  0x1b   :  { %165 = vmatpush.msra.mxu0 %v78_v22  ;;  %223 = vmatpush.msra.mxu3 %v133_v29  ;;  %v111_v43 = vld [vmem:[#allocation2 + $0x1c8] sm:$0xff]  ;;  %v121_v45 = vld [vmem:[#allocation2 + $0x218] sm:$0xff]  ;;  %v60_v46 = vld [vmem:[#allocation2 + $0x30] sm:$0xff] }
  0x1c   :  { %185 = vmatpush.msra.mxu1 %v126_v23  ;;  %204 = vmatpush.msra.mxu2 %v82_v32  ;;  %v108_v47 = vld [vmem:[#allocation2 + $0x1b0] sm:$0xff]  ;;  %v70_v48 = vld [vmem:[#allocation2 + $0x80] sm:$0xff]  ;;  %v57_v50 = vld [vmem:[#allocation2 + $0x18] sm:$0xff] }
  0x1d   :  { %166 = vmatpush.msra.mxu0 %v75_v26  ;;  %224 = vmatpush.msra.mxu3 %v130_v33  ;;  %v118_v49 = vld [vmem:[#allocation2 + $0x200] sm:$0xff]  ;;  %v105_v51 = vld [vmem:[#allocation2 + $0x198] sm:$0xff]  ;;  %v67_v52 = vld [vmem:[#allocation2 + $0x68] sm:$0xff] }
  0x1e   :  { %186 = vmatpush.msra.mxu1 %v123_v27  ;;  %205 = vmatpush.msra.mxu2 %v79_v36  ;;  %v115_v53 = vld [vmem:[#allocation2 + $0x1e8] sm:$0xff]  ;;  %v54_v54 = vld [vmem:[#allocation2] sm:$0xff]  ;;  %v101_v56 = vld [vmem:[#allocation2 + $0x178] sm:$0xff] }
  0x1f   :  { %167 = vmatpush.msra.mxu0 %v72_v30  ;;  %225 = vmatpush.msra.mxu3 %v127_v37  ;;  %v102_v55 = vld [vmem:[#allocation2 + $0x180] sm:$0xff]  ;;  %v149_v57 = vld [vmem:[#allocation2 + $0x2f8] sm:$0xff]  ;;  %v64_v58 = vld [vmem:[#allocation2 + $0x50] sm:$0xff] }
  0x20   :  { %187 = vmatpush.msra.mxu1 %v120_v31  ;;  %206 = vmatpush.msra.mxu2 %v76_v40  ;;  %v112_v59 = vld [vmem:[#allocation2 + $0x1d0] sm:$0xff]  ;;  %v98_v60 = vld [vmem:[#allocation2 + $0x160] sm:$0xff]  ;;  %v61_v62 = vld [vmem:[#allocation2 + $0x38] sm:$0xff] }
  0x21   :  { %168 = vmatpush.msra.mxu0 %v69_v34  ;;  %226 = vmatpush.msra.mxu3 %v124_v41  ;;  %v146_v61 = vld [vmem:[#allocation2 + $0x2e0] sm:$0xff]  ;;  %v109_v63 = vld [vmem:[#allocation2 + $0x1b8] sm:$0xff]  ;;  %v95_v0 = vld [vmem:[#allocation2 + $0x148] sm:$0xff] }
  0x22   :  { %188 = vmatpush.msra.mxu1 %v117_v35  ;;  %207 = vmatpush.msra.mxu2 %v73_v44  ;;  %v143_v1 = vld [vmem:[#allocation2 + $0x2c8] sm:$0xff]  ;;  %v58_v2 = vld [vmem:[#allocation2 + $0x20] sm:$0xff]  ;;  %v92_v4 = vld [vmem:[#allocation2 + $0x130] sm:$0xff] }
  0x23   :  { %169 = vmatpush.msra.mxu0 %v66_v38  ;;  %227 = vmatpush.msra.mxu3 %v121_v45  ;;  %v106_v3 = vld [vmem:[#allocation2 + $0x1a0] sm:$0xff]  ;;  %v140_v5 = vld [vmem:[#allocation2 + $0x2b0] sm:$0xff]  ;;  %v55_v6 = vld [vmem:[#allocation2 + $0x8] sm:$0xff] }
  0x24   :  { %189 = vmatpush.msra.mxu1 %v114_v39  ;;  %208 = vmatpush.msra.mxu2 %v70_v48  ;;  %v103_v7 = vld [vmem:[#allocation2 + $0x188] sm:$0xff]  ;;  %v89_v8 = vld [vmem:[#allocation2 + $0x118] sm:$0xff]  ;;  %v518_v10 = vld [vmem:[%s552_s0] sm:$0xff] }
  0x25   :  { %170 = vmatpush.msra.mxu0 %v63_v42  ;;  %228 = vmatpush.msra.mxu3 %v118_v49  ;;  %v137_v9 = vld [vmem:[#allocation2 + $0x298] sm:$0xff]  ;;  %v523_v11 = vld [vmem:[%s552_s0 + $0x8] sm:$0xff]  ;;  %v86_v12 = vld [vmem:[#allocation2 + $0x100] sm:$0xff] }
  0x26   :  { %190 = vmatpush.msra.mxu1 %v111_v43  ;;  %209 = vmatpush.msra.mxu2 %v67_v52  ;;  %v134_v13 = vld [vmem:[#allocation2 + $0x280] sm:$0xff]  ;;  %v83_v14 = vld [vmem:[#allocation2 + $0xe8] sm:$0xff]  ;;  %v296_v16 = vld [vmem:[#allocation4 + $0x78] sm:$0xff] }
  0x27   :  { %171 = vmatpush.msra.mxu0 %v60_v46  ;;  %229 = vmatpush.msra.mxu3 %v115_v53  ;;  %v131_v15 = vld [vmem:[#allocation2 + $0x268] sm:$0xff]  ;;  %v338_v17 = vld [vmem:[#allocation4 + $0xf8] sm:$0xff]  ;;  %v80_v18 = vld [vmem:[#allocation2 + $0xd0] sm:$0xff] }
  0x28   :  { %191 = vmatpush.msra.mxu1 %v108_v47  ;;  %210 = vmatpush.msra.mxu2 %v64_v58  ;;  %v128_v19 = vld [vmem:[#allocation2 + $0x250] sm:$0xff]  ;;  %v77_v22 = vld [vmem:[#allocation2 + $0xb8] sm:$0xff]  ;;  %v294_v24 = vld [vmem:[#allocation4 + $0x68] sm:$0xff] }
  0x29   :  { %172 = vmatpush.msra.mxu0 %v57_v50  ;;  %230 = vmatpush.msra.mxu3 %v112_v59  ;;  %v295_v20 = vld [vmem:[#allocation4 + $0x70] sm:$0xff]  ;;  %v125_v23 = vld [vmem:[#allocation2 + $0x238] sm:$0xff]  ;;  %v336_v25 = vld [vmem:[#allocation4 + $0xe8] sm:$0xff] }
  0x2a   :  { %192 = vmatpush.msra.mxu1 %v105_v51  ;;  %211 = vmatpush.msra.mxu2 %v61_v62  ;;  %v337_v21 = vld [vmem:[#allocation4 + $0xf0] sm:$0xff]  ;;  %v74_v26 = vld [vmem:[#allocation2 + $0xa0] sm:$0xff]  ;;  %v71_v30 = vld [vmem:[#allocation2 + $0x88] sm:$0xff] }
  0x2b   :  { %173 = vmatpush.msra.mxu0 %v54_v54  ;;  %231 = vmatpush.msra.mxu3 %v109_v63  ;;  %v122_v27 = vld [vmem:[#allocation2 + $0x220] sm:$0xff]  ;;  %v119_v31 = vld [vmem:[#allocation2 + $0x208] sm:$0xff]  ;;  %v292_v32 = vld [vmem:[#allocation4 + $0x58] sm:$0xff] }
  0x2c   :  { %193 = vmatpush.msra.mxu1 %v102_v55  ;;  %212 = vmatpush.msra.mxu2 %v58_v2  ;;  %v293_v28 = vld [vmem:[#allocation4 + $0x60] sm:$0xff]  ;;  %v334_v33 = vld [vmem:[#allocation4 + $0xd8] sm:$0xff]  ;;  %v68_v34 = vld [vmem:[#allocation2 + $0x70] sm:$0xff] }
  0x2d   :  { %238 = vmatpush.msrb.mxu0 %v101_v56  ;;  %232 = vmatpush.msra.mxu3 %v106_v3  ;;  %v335_v29 = vld [vmem:[#allocation4 + $0xe0] sm:$0xff]  ;;  %v116_v35 = vld [vmem:[#allocation2 + $0x1f0] sm:$0xff]  ;;  %v65_v38 = vld [vmem:[#allocation2 + $0x58] sm:$0xff] }
  0x2e   :  { %258 = vmatpush.msrb.mxu1 %v149_v57  ;;  %213 = vmatpush.msra.mxu2 %v55_v6  ;;  %v291_v36 = vld [vmem:[#allocation4 + $0x50] sm:$0xff]  ;;  %v113_v39 = vld [vmem:[#allocation2 + $0x1d8] sm:$0xff]  ;;  %v290_v40 = vld [vmem:[#allocation4 + $0x48] sm:$0xff] }
  0x2f   :  { %239 = vmatpush.msrb.mxu0 %v98_v60  ;;  %233 = vmatpush.msra.mxu3 %v103_v7  ;;  %v333_v37 = vld [vmem:[#allocation4 + $0xd0] sm:$0xff]  ;;  %v332_v41 = vld [vmem:[#allocation4 + $0xc8] sm:$0xff]  ;;  %v62_v42 = vld [vmem:[#allocation2 + $0x40] sm:$0xff] }
  0x30   :  { %259 = vmatpush.msrb.mxu1 %v146_v61  ;;  %214 = vmatmul.f32.vlgmr.msra.gmra.mxu2 %v518_v10  ;;  %v110_v43 = vld [vmem:[#allocation2 + $0x1c0] sm:$0xff]  ;;  %v59_v46 = vld [vmem:[#allocation2 + $0x28] sm:$0xff]  ;;  %v288_v48 = vld [vmem:[#allocation4 + $0x38] sm:$0xff] }
  0x31   :  { %240 = vmatpush.msrb.mxu0 %v95_v0  ;;  %234 = vmatmul.f32.vlgmr.msra.gmra.mxu3 %v523_v11  ;;  %v289_v44 = vld [vmem:[#allocation4 + $0x40] sm:$0xff]  ;;  %v107_v47 = vld [vmem:[#allocation2 + $0x1a8] sm:$0xff]  ;;  %v330_v49 = vld [vmem:[#allocation4 + $0xb8] sm:$0xff] }
  0x32   :  { %260 = vmatpush.msrb.mxu1 %v143_v1  ;;  %174 = vmatmul.f32.vlgmr.msra.gmra.mxu0 %v518_v10  ;;  %v331_v45 = vld [vmem:[#allocation4 + $0xc0] sm:$0xff]  ;;  %v56_v50 = vld [vmem:[#allocation2 + $0x10] sm:$0xff]  ;;  %v380_v52 = vld [vmem:[#allocation4 + $0x178] sm:$0xff] }
  0x33   :  { %241 = vmatpush.msrb.mxu0 %v92_v4  ;;  %194 = vmatmul.f32.vlgmr.msra.gmra.mxu1 %v523_v11  ;;  %v104_v51 = vld [vmem:[#allocation2 + $0x190] sm:$0xff]  ;;  %v286_v56 = vld [vmem:[#allocation4 + $0x28] sm:$0xff]  ;;  %v285_v59 = vld [vmem:[#allocation4 + $0x20] sm:$0xff] }
  0x34   :  { %261 = vmatpush.msrb.mxu1 %v140_v5  ;;  %301 = vmatpush.msrb.mxu2 %v296_v16  ;;  %v287_v53 = vld [vmem:[#allocation4 + $0x30] sm:$0xff]  ;;  %v328_v57 = vld [vmem:[#allocation4 + $0xa8] sm:$0xff]  ;;  %v377_v60 = vld [vmem:[#allocation4 + $0x160] sm:$0xff] }
  0x35   :  { %242 = vmatpush.msrb.mxu0 %v89_v8  ;;  %343 = vmatpush.msrb.mxu3 %v338_v17  ;;  %v329_v54 = vld [vmem:[#allocation4 + $0xb0] sm:$0xff]  ;;  %v378_v58 = vld [vmem:[#allocation4 + $0x168] sm:$0xff]  ;;  %v376_v61 = vld [vmem:[#allocation4 + $0x158] sm:$0xff] }
  0x36   :  { %262 = vmatpush.msrb.mxu1 %v137_v9  ;;  %302 = vmatpush.msrb.mxu2 %v295_v20  ;;  %v379_v55 = vld [vmem:[#allocation4 + $0x170] sm:$0xff]  ;;  %v374_v63 = vld [vmem:[#allocation4 + $0x148] sm:$0xff]  ;;  %v373_v0 = vld [vmem:[#allocation4 + $0x140] sm:$0xff] }
  0x37   :  { %243 = vmatpush.msrb.mxu0 %v86_v12  ;;  %344 = vmatpush.msrb.mxu3 %v337_v21  ;;  %v375_v62 = vld [vmem:[#allocation4 + $0x150] sm:$0xff]  ;;  %v284_v1 = vld [vmem:[#allocation4 + $0x18] sm:$0xff]  ;;  %v327_v2 = vld [vmem:[#allocation4 + $0xa0] sm:$0xff] }
  0x38   :  { %263 = vmatpush.msrb.mxu1 %v134_v13  ;;  %303 = vmatpush.msrb.mxu2 %v294_v24  ;;  %v372_v3 = vld [vmem:[#allocation4 + $0x138] sm:$0xff]  ;;  %v283_v4 = vld [vmem:[#allocation4 + $0x10] sm:$0xff]  ;;  %v282_v7 = vld [vmem:[#allocation4 + $0x8] sm:$0xff] }
  0x39   :  { %244 = vmatpush.msrb.mxu0 %v83_v14  ;;  %345 = vmatpush.msrb.mxu3 %v336_v25  ;;  %v326_v5 = vld [vmem:[#allocation4 + $0x98] sm:$0xff]  ;;  %v371_v6 = vld [vmem:[#allocation4 + $0x130] sm:$0xff]  ;;  %v370_v9 = vld [vmem:[#allocation4 + $0x128] sm:$0xff] }
  0x3a   :  { %264 = vmatpush.msrb.mxu1 %v131_v15  ;;  %304 = vmatpush.msrb.mxu2 %v293_v28  ;;  %v325_v8 = vld [vmem:[#allocation4 + $0x90] sm:$0xff]  ;;  %v369_v12 = vld [vmem:[#allocation4 + $0x120] sm:$0xff]  ;;  %v368_v14 = vld [vmem:[#allocation4 + $0x118] sm:$0xff] }
  0x3b   :  { %245 = vmatpush.msrb.mxu0 %v80_v18  ;;  %346 = vmatpush.msrb.mxu3 %v335_v29  ;;  %v323_v13 = vld [vmem:[#allocation4 + $0x80] sm:$0xff]  ;;  %v367_v15 = vld [vmem:[#allocation4 + $0x110] sm:$0xff]  ;;  %v366_v16 = vld [vmem:[#allocation4 + $0x108] sm:$0xff] }
  0x3c   :  { %265 = vmatpush.msrb.mxu1 %v128_v19  ;;  %305 = vmatpush.msrb.mxu2 %v292_v32  ;;  %v365_v17 = vld [vmem:[#allocation4 + $0x100] sm:$0xff] }
  0x3d   :  { %246 = vmatpush.msrb.mxu0 %v77_v22  ;;  %347 = vmatpush.msrb.mxu3 %v334_v33  ;;  %v150_v18 = vld [vmem:[%s554_s2] sm:$0x7] }
  0x3e   :  { %266 = vmatpush.msrb.mxu1 %v125_v23  ;;  %306 = vmatpush.msrb.mxu2 %v291_v36  ;;  %v152_v19 = vperm.slane %v150_v18, 0  ;;  %v153_v23 = vperm.slane %v150_v18, 1 }
  0x3f   :  { %247 = vmatpush.msrb.mxu0 %v74_v26  ;;  %348 = vmatpush.msrb.mxu3 %v333_v37  ;;  %v418_v37 = vld [vmem:[%s556_s4] ss:$0 sm:$0xff] }
  0x40   :  { %267 = vmatpush.msrb.mxu1 %v122_v27  ;;  %307 = vmatpush.msrb.mxu2 %v290_v40  ;;  %v419_v40 = vld [vmem:[%s556_s4 + $0x1] ss:$0 sm:$0xff] }
  0x41   :  { %248 = vmatpush.msrb.mxu0 %v71_v30  ;;  %349 = vmatpush.msrb.mxu3 %v332_v41 }
  0x42   :  { %268 = vmatpush.msrb.mxu1 %v119_v31  ;;  %308 = vmatpush.msrb.mxu2 %v289_v44  ;;  %v154_v31 = vperm.slane %v150_v18, 2 }
  0x43   :  { %249 = vmatpush.msrb.mxu0 %v68_v34  ;;  %350 = vmatpush.msrb.mxu3 %v331_v45 }
  0x44   :  { %269 = vmatpush.msrb.mxu1 %v116_v35  ;;  %309 = vmatpush.msrb.mxu2 %v288_v48 }
  0x45   :  { %250 = vmatpush.msrb.mxu0 %v65_v38  ;;  %351 = vmatpush.msrb.mxu3 %v330_v49 }
  0x46   :  { %270 = vmatpush.msrb.mxu1 %v113_v39  ;;  %310 = vmatpush.msrb.mxu2 %v287_v53 }
  0x47   :  { %251 = vmatpush.msrb.mxu0 %v62_v42  ;;  %352 = vmatpush.msrb.mxu3 %v329_v54 }
  0x48   :  { %271 = vmatpush.msrb.mxu1 %v110_v43  ;;  %311 = vmatpush.msrb.mxu2 %v286_v56  ;;  %v420_v43 = vld [vmem:[%s556_s4 + $0x2] ss:$0 sm:$0xff] }
  0x49   :  { %252 = vmatpush.msrb.mxu0 %v59_v46  ;;  %353 = vmatpush.msrb.mxu3 %v328_v57 }
  0x4a   :  { %272 = vmatpush.msrb.mxu1 %v107_v47  ;;  %312 = vmatpush.msrb.mxu2 %v285_v59 }
  0x4b   :  { %253 = vmatpush.msrb.mxu0 %v56_v50  ;;  %354 = vmatpush.msrb.mxu3 %v327_v2 }
  0x4c   :  { %273 = vmatpush.msrb.mxu1 %v104_v51  ;;  %254 = vmatmul.f32.vlgmr.msrb.gmra.mxu0 %v518_v10  ;;  %v281_v10 = vld [vmem:[#allocation4] sm:$0xff] }
  0x4d   :  { %274 = vmatmul.f32.vlgmr.msrb.gmra.mxu1 %v523_v11  ;;  %385 = vmatpush.msra.mxu0 %v380_v52  ;;  %v324_v11 = vld [vmem:[#allocation4 + $0x88] sm:$0xff] }
  0x4e   :  { %313 = vmatpush.msrb.mxu2 %v284_v1  ;;  %355 = vmatpush.msrb.mxu3 %v326_v5 }
  0x4f   :  { %386 = vmatpush.msra.mxu0 %v379_v55 }
  0x50   :  { %314 = vmatpush.msrb.mxu2 %v283_v4  ;;  %356 = vmatpush.msrb.mxu3 %v325_v8 }
  0x51   :  { %387 = vmatpush.msra.mxu0 %v378_v58 }
  0x52   :  { %315 = vmatpush.msrb.mxu2 %v282_v7  ;;  %357 = vmatpush.msrb.mxu3 %v324_v11 }
  0x53   :  { %388 = vmatpush.msra.mxu0 %v377_v60 }
  0x54   :  { %316 = vmatpush.msrb.mxu2 %v281_v10  ;;  %358 = vmatpush.msrb.mxu3 %v323_v13 }
  0x55   :  { %389 = vmatpush.msra.mxu0 %v376_v61 }
  0x57   :  { %390 = vmatpush.msra.mxu0 %v375_v62 }
  0x59   :  { %391 = vmatpush.msra.mxu0 %v374_v63 }
  0x5b   :  { %392 = vmatpush.msra.mxu0 %v373_v0 }
  0x5d   :  { %393 = vmatpush.msra.mxu0 %v372_v3 }
  0x5f   :  { %394 = vmatpush.msra.mxu0 %v371_v6 }
  0x61   :  { %395 = vmatpush.msra.mxu0 %v370_v9 }
  0x63   :  { %396 = vmatpush.msra.mxu0 %v369_v12 }
  0x65   :  { %397 = vmatpush.msra.mxu0 %v368_v14 }
  0x67   :  { %398 = vmatpush.msra.mxu0 %v367_v15 }
  0x69   :  { %399 = vmatpush.msra.mxu0 %v366_v16 }
  0x6b   :  { %400 = vmatpush.msra.mxu0 %v365_v17 }
  0xaf   :  { %v175_v20 = vpop.f32.mrf.mxu0 }
  0xb0   :  { %v195_v21 = vpop.f32.mrf.mxu1  ;;  %v176_v22 = vadd.f32 %v175_v20, %v152_v19 }
  0xb2   :  { %v196_v24 = vadd.f32 %v195_v21, %v176_v22 }
  0xb3   :  { %v215_v25 = vpop.f32.mrf.mxu2 }
  0xb4   :  { %v235_v26 = vpop.f32.mrf.mxu3  ;;  %v278_v27 = vmax.f32 %v196_v24, 0.0  ;;  %v216_v28 = vadd.f32 %v215_v25, %v153_v23 }
  0xb6   :  { %v236_v29 = vadd.f32 %v235_v26, %v216_v28  ;;  %317 = vmatmul.f32.vlgmr.msrb.gmra.mxu2 %v278_v27 }
  0xb8   :  { %v279_v30 = vmax.f32 %v236_v29, 0.0 }
  0xba   :  { %359 = vmatmul.f32.vlgmr.msrb.gmra.mxu3 %v279_v30 }
  0xc9   :  { %v255_v32 = vpop.f32.mrf.mxu0 }
  0xca   :  { %v275_v33 = vpop.f32.mrf.mxu1  ;;  %v256_v34 = vadd.f32 %v255_v32, %v154_v31 }
  0xcc   :  { %v276_v35 = vadd.f32 %v275_v33, %v256_v34 }
  0xce   :  { %v280_v36 = vmax.f32 %v276_v35, 0.0 }
  0xd0   :  { %401 = vmatmul.f32.vlgmr.msra.gmra.mxu0 %v280_v36 }
 0x139   :  { %v318_v38 = vpop.f32.mrf.mxu2 }
 0x13a   :  { %v319_v39 = vadd.f32 %v418_v37, %v318_v38 }
 0x13c   :  { %321 = vst [vmem:[%s557_s5] sm:$0xff] %v319_v39 }
 0x13d   :  { %v360_v41 = vpop.f32.mrf.mxu3 }
 0x13e   :  { %v361_v42 = vadd.f32 %v419_v40, %v360_v41 }
 0x140   :  { %363 = vst [vmem:[%s557_s5 + $0x8] sm:$0xff] %v361_v42 }
 0x14d   :  { %v402_v44 = vpop.f32.mrf.mxu0 }
 0x14e   :  { %v403_v45 = vadd.f32 %v420_v43, %v402_v44 }
 0x150   :  { %405 = vst [vmem:[%s557_s5 + $0x10] sm:$0xff] %v403_v45 }
 0x151   :  { %410 = vsyncpa [#allocation3], 1 }
 0x152   :  { %411 = vsyncpa [#allocation5], 1 }

</bundles_post_ra>
